<compile_context>
chip_gen: v5e
topology: v5e:2x2
jax: 0.10.0
libtpu: 0.0.40
codegen_flags: <defaults>
</compile_context>

<pallas_src>
import functools

import numpy as np

import jax
import jax.numpy as jnp
from jax.experimental import pallas as pl
from jax.experimental.pallas import tpu as pltpu


def _interp_matrix_np(in_size: int, out_size: int) -> np.ndarray:
    """1-D bilinear resize matrix A (out_size, in_size), align_corners=True:  y = A @ x."""
    A = np.zeros((out_size, in_size), np.float32)
    if out_size == 1 or in_size == 1:
        A[:, 0] = 1.0
        return A
    src = np.arange(out_size, dtype=np.float64) * (in_size - 1) / (out_size - 1)
    i0 = np.clip(np.floor(src).astype(np.int64), 0, in_size - 1)
    i1 = np.minimum(i0 + 1, in_size - 1)
    frac = (src - i0).astype(np.float32)
    rows = np.arange(out_size)
    np.add.at(A, (rows, i0), 1.0 - frac)
    np.add.at(A, (rows, i1), frac)
    return A


def _pick_row_tile(Ho: int, Wo: int, c_tot: int,
                   dtype_bytes: int = 4, budget_bytes: int = 2 * 1024 * 1024) -> int:
    """Largest row tile (multiple of 8 dividing Ho) whose output block fits the budget,
    keeping tile columns (tho*Wo) lane-aligned (multiple of 128) unless it's the full slab."""
    if Ho % 8 != 0:
        return Ho
    tho = Ho
    while tho > 8 and tho * Wo * c_tot * dtype_bytes > budget_bytes:
        nxt = tho // 2
        if nxt % 8 != 0 or Ho % nxt != 0:
            break
        tho = nxt
    if tho != Ho and (tho * Wo) % 128 != 0:
        return Ho
    return tho


def up_con_kernel(w_ref, x1_ref, kup_ref, x2_hbm, out_ref, skip_sem, *, c_skip, cols):
    r = pl.program_id(0)   # row tile of the upsampled output
    n = pl.program_id(1)   # batch sample

    # Skip connection: DMA the matching slab of x2 straight from HBM into the first
    # c_skip output channels of the VMEM output block; overlaps with the matmuls below.
    skip_cp = pltpu.make_async_copy(
        x2_hbm.at[n, :, pl.ds(r * cols, cols)],     # (Cskip, cols) strided HBM read
        out_ref.at[0, pl.ds(0, c_skip)],            # (Cskip, cols) VMEM dst
        skip_sem,
    )
    skip_cp.start()

    # 1x1 conv (channel mix) at low resolution: (Cout, Cin) @ (Cin, H*W), f32 MXU.
    mix = jnp.dot(w_ref[...], x1_ref[0], preferred_element_type=jnp.float32)

    # 2x bilinear upsample (this row tile) as one lane-dense bf16 MXU matmul:
    # (Cout, H*W) @ kron(Ah, Aw)^T[:, tile] -> (Cout, tho*Wo), f32 accumulation.
    up = jnp.dot(mix.astype(kup_ref.dtype), kup_ref[...],
                 preferred_element_type=jnp.float32)
    out_ref[0, c_skip:] = up.astype(out_ref.dtype)

    skip_cp.wait()


def up_con(x1, x2, conv_w, *, row_tile=None, vmem_limit_bytes=48 * 1024 * 1024):
    """x1: (N, Cin, H, W), x2: (N, Cskip, 2H, 2W), conv_w: (Cout, Cin, 1, 1) bias-free."""
    N, Cin, H, W = x1.shape
    Cout = conv_w.shape[0]
    N2, Cskip, Ho, Wo = x2.shape
    assert N2 == N and Ho == 2 * H and Wo == 2 * W
    assert conv_w.shape[1] == Cin and conv_w.shape[2:] == (1, 1)
    assert x1.dtype == x2.dtype
    Ctot = Cskip + Cout
    HW, HWo = H * W, Ho * Wo

    # TODO(synk): for large feature maps (H*W > ~4K) the dense kron matrix stops being
    # VMEM-friendly; switch to a separable Ah/Aw two-matmul path with W-column tiling.
    assert HW <= 4096, "kron upsample path is sized for small/medium feature maps"

    # Constants built with numpy at trace time (baked next to the pallas_call).
    Ah = _interp_matrix_np(H, Ho)                                   # (Ho, H)
    Aw = _interp_matrix_np(W, Wo)                                   # (Wo, W)
    kup = jnp.asarray(np.kron(Ah, Aw).T, dtype=jnp.bfloat16)        # (H*W, Ho*Wo)

    w2d = conv_w.reshape(Cout, Cin).astype(jnp.float32)
    x1f = x1.reshape(N, Cin, HW)          # free HBM reshape, lane-dense last dim
    x2f = x2.reshape(N, Cskip, HWo)

    tho = _pick_row_tile(Ho, Wo, Ctot) if row_tile is None else int(row_tile)
    assert Ho % tho == 0, "row tile must divide the upsampled height"
    assert tho == Ho or (tho * Wo) % 128 == 0, "row tiles must be lane-aligned"
    R = Ho // tho
    cols = tho * Wo

    kernel = functools.partial(up_con_kernel, c_skip=Cskip, cols=cols)
    outf = pl.pallas_call(
        kernel,
        out_shape=jax.ShapeDtypeStruct((N, Ctot, HWo), x1.dtype),
        grid=(R, N),
        in_specs=[
            pl.BlockSpec((Cout, Cin), lambda r, n: (0, 0)),      # conv weights, VMEM resident
            pl.BlockSpec((1, Cin, HW), lambda r, n: (n, 0, 0)),  # x1 low-res slab per sample
            pl.BlockSpec((HW, cols), lambda r, n: (0, r)),       # kron(Ah,Aw)^T column tile
            pl.BlockSpec(memory_space=pl.ANY),                   # x2 stays in HBM; DMA'd in-kernel
        ],
        out_specs=pl.BlockSpec((1, Ctot, cols), lambda r, n: (n, 0, r)),
        scratch_shapes=[pltpu.SemaphoreType.DMA(())],
        compiler_params=pltpu.CompilerParams(
            dimension_semantics=("parallel", "parallel"),
            vmem_limit_bytes=vmem_limit_bytes,
        ),
    )(w2d, x1f, kup, x2f)

    return outf.reshape(N, Ctot, Ho, Wo)


def up_con_reference(x1, x2, conv_w):
    """Pure-JAX f32 reference mirroring the PyTorch forward (upsample, then conv, concat)."""
    N, Cin, H, W = x1.shape
    Ah = jnp.asarray(_interp_matrix_np(H, 2 * H))
    Aw = jnp.asarray(_interp_matrix_np(W, 2 * W))
    up = jnp.einsum('oh,nchw,pw->ncop', Ah, x1, Aw, precision='highest')
    w2d = conv_w.reshape(conv_w.shape[0], -1).astype(jnp.float32)
    y = jnp.einsum('ki,nihw->nkhw', w2d, up, precision='highest')
    return jnp.concatenate([x2, y], axis=1)


if __name__ == "__main__":
    key = jax.random.PRNGKey(0)
    k1, k2, k3 = jax.random.split(key, 3)

    # Small shapes consistent with the module (in_channels=4, out_channels=8).
    N, Cin, H, W = 2, 4, 16, 16
    Cout = 8          # conv out_channels
    Cskip = 8         # channels of the skip connection x2

    x1 = jax.random.normal(k1, (N, Cin, H, W), jnp.float32)
    x2 = jax.random.normal(k2, (N, Cskip, 2 * H, 2 * W), jnp.float32)
    conv_w = jax.random.normal(k3, (Cout, Cin, 1, 1), jnp.float32) / jnp.sqrt(Cin)

    ref = up_con_reference(x1, x2, conv_w)

    # Default path: auto row tile (full slab at these shapes).
    out = jax.jit(up_con)(x1, x2, conv_w)
    jax.block_until_ready(out)
    assert out.shape == (N, Cskip + Cout, 2 * H, 2 * W)
    # bf16 MXU operands on the upsample matmul -> ~1e-3 relative error; loosen tolerance.
    assert bool(jnp.allclose(out, ref, rtol=2e-2, atol=3e-2)), "mismatch vs reference"

    # Row-tiled path (exercises the Ho row-tile grid axis used for large decoder shapes).
    out_t = jax.jit(functools.partial(up_con, row_tile=8))(x1, x2, conv_w)
    jax.block_until_ready(out_t)
    assert bool(jnp.allclose(out_t, ref, rtol=2e-2, atol=3e-2)), "row-tiled mismatch vs reference"

    print("KERNEL_OK")
</pallas_src>

<mosaic_0001>
module attributes {stable_mosaic.version = 11 : i64} {
  func.func @up_con_kernel(%arg0: i32, %arg1: i32, %arg2: memref<8x4xf32, #tpu.memory_space<vmem>>, %arg3: memref<1x4x256xf32, #tpu.memory_space<vmem>>, %arg4: memref<256x1024xbf16, #tpu.memory_space<vmem>>, %arg5: memref<2x8x1024xf32, #tpu.memory_space<any>>, %arg6: memref<1x16x1024xf32, #tpu.memory_space<vmem>>, %arg7: memref<!tpu.dma_semaphore, #tpu.memory_space<semaphore_mem>>) attributes {dimension_semantics = [#tpu.dimension_semantics<parallel>, #tpu.dimension_semantics<parallel>], iteration_bounds = array<i64: 1, 2>, scalar_prefetch = 0 : i64, scratch_operands = 1 : i64, tpu.core_type = #tpu.core_type<tc>, window_params = [{pipeline_mode = #tpu.pipeline_mode<synchronous>, transform_indices = @transform_0, window_bounds = array<i64: 8, 4>}, {transform_indices = @transform_1, window_bounds = array<i64: 1, 4, 256>}, {transform_indices = @transform_2, window_bounds = array<i64: 256, 1024>}, {}, {transform_indices = @transform_4, window_bounds = array<i64: 1, 16, 1024>}]} {
    %c1024_i32 = arith.constant 1024 : i32
    %0 = arith.muli %arg0, %c1024_i32 : i32
    %c0_i32 = arith.constant 0 : i32
    %c0_i32_0 = arith.constant 0 : i32
    %1 = tpu.memref_slice %arg5[%arg1, %c0_i32_0, %0] : memref<2x8x1024xf32, #tpu.memory_space<any>> -> memref<1x8x1024xf32, #tpu.memory_space<any>>
    %2 = tpu.memref_squeeze %1 : memref<1x8x1024xf32, #tpu.memory_space<any>> -> memref<8x1024xf32, #tpu.memory_space<any>>
    %c0_i32_1 = arith.constant 0 : i32
    %c0_i32_2 = arith.constant 0 : i32
    %3 = tpu.memref_slice %arg6[%c0_i32, %c0_i32_1, %c0_i32_2] : memref<1x16x1024xf32, #tpu.memory_space<vmem>> -> memref<1x8x1024xf32, #tpu.memory_space<vmem>>
    %4 = tpu.memref_squeeze %3 : memref<1x8x1024xf32, #tpu.memory_space<vmem>> -> memref<8x1024xf32, #tpu.memory_space<vmem>>
    tpu.enqueue_dma source(%2 : memref<8x1024xf32, #tpu.memory_space<any>>) target(%4 : memref<8x1024xf32, #tpu.memory_space<vmem>>) target_semaphore(%arg7 : memref<!tpu.dma_semaphore, #tpu.memory_space<semaphore_mem>>)
    %c0 = arith.constant 0 : index
    %c0_3 = arith.constant 0 : index
    %5 = vector.load %arg2[%c0, %c0_3] : memref<8x4xf32, #tpu.memory_space<vmem>>, vector<8x4xf32>
    %c0_4 = arith.constant 0 : index
    %c0_5 = arith.constant 0 : index
    %c0_6 = arith.constant 0 : index
    %6 = vector.load %arg3[%c0_4, %c0_5, %c0_6] : memref<1x4x256xf32, #tpu.memory_space<vmem>>, vector<1x4x256xf32>
    %7 = vector.shape_cast %6 : vector<1x4x256xf32> to vector<4x256xf32>
    %cst = arith.constant dense<0.000000e+00> : vector<8x256xf32>
    %8 = tpu.matmul %5, %7, %cst {dimension_numbers = #tpu.dot_dimension_numbers<[1], [0], [0], [1], [0, 0, 1, 1], [], []>} : vector<8x4xf32>, vector<4x256xf32>, vector<8x256xf32> -> vector<8x256xf32>
    %9 = arith.truncf %8 : vector<8x256xf32> to vector<8x256xbf16>
    %c0_7 = arith.constant 0 : index
    %c0_8 = arith.constant 0 : index
    %10 = vector.load %arg4[%c0_7, %c0_8] : memref<256x1024xbf16, #tpu.memory_space<vmem>>, vector<256x1024xbf16>
    %cst_9 = arith.constant dense<0.000000e+00> : vector<8x1024xf32>
    %11 = tpu.matmul %9, %10, %cst_9 {dimension_numbers = #tpu.dot_dimension_numbers<[1], [0], [0], [1], [0, 0, 1, 1], [], []>} : vector<8x256xbf16>, vector<256x1024xbf16>, vector<8x1024xf32> -> vector<8x1024xf32>
    %c0_10 = arith.constant 0 : index
    %c8 = arith.constant 8 : index
    %c0_11 = arith.constant 0 : index
    %12 = vector.load %arg6[%c0_10, %c8, %c0_11] : memref<1x16x1024xf32, #tpu.memory_space<vmem>>, vector<1x8x1024xf32>
    %13 = vector.shape_cast %12 : vector<1x8x1024xf32> to vector<8x1024xf32>
    %14 = vector.shape_cast %11 : vector<8x1024xf32> to vector<1x8x1024xf32>
    tpu.vector_store %arg6[%c0_10, %c8, %c0_11], %14 {strides = array<i32>} : memref<1x16x1024xf32, #tpu.memory_space<vmem>>, vector<1x8x1024xf32>,
    %c0_i32_12 = arith.constant 0 : i32
    %c0_i32_13 = arith.constant 0 : i32
    %15 = tpu.memref_slice %arg5[%arg1, %c0_i32_13, %0] : memref<2x8x1024xf32, #tpu.memory_space<any>> -> memref<1x8x1024xf32, #tpu.memory_space<any>>
    %16 = tpu.memref_squeeze %15 : memref<1x8x1024xf32, #tpu.memory_space<any>> -> memref<8x1024xf32, #tpu.memory_space<any>>
    %c0_i32_14 = arith.constant 0 : i32
    %c0_i32_15 = arith.constant 0 : i32
    %17 = tpu.memref_slice %arg6[%c0_i32_12, %c0_i32_14, %c0_i32_15] : memref<1x16x1024xf32, #tpu.memory_space<vmem>> -> memref<1x8x1024xf32, #tpu.memory_space<vmem>>
    %18 = tpu.memref_squeeze %17 : memref<1x8x1024xf32, #tpu.memory_space<vmem>> -> memref<8x1024xf32, #tpu.memory_space<vmem>>
    tpu.wait_dma2 semaphore(%arg7 : memref<!tpu.dma_semaphore, #tpu.memory_space<semaphore_mem>>) src(%16 : memref<8x1024xf32, #tpu.memory_space<any>>) dst(%18 : memref<8x1024xf32, #tpu.memory_space<vmem>>)
    return
  }
  func.func @transform_0(%arg0: i32, %arg1: i32) -> (i32, i32) {
    %c0_i32 = arith.constant 0 : i32
    %c0_i32_0 = arith.constant 0 : i32
    %c0_i32_1 = arith.constant 0 : i32
    return %c0_i32, %c0_i32_0 : i32, i32
  }
  func.func @transform_1(%arg0: i32, %arg1: i32) -> (i32, i32, i32) {
    %c0_i32 = arith.constant 0 : i32
    %c0_i32_0 = arith.constant 0 : i32
    %c0_i32_1 = arith.constant 0 : i32
    return %arg1, %c0_i32, %c0_i32_0 : i32, i32, i32
  }
  func.func @transform_2(%arg0: i32, %arg1: i32) -> (i32, i32) {
    %c0_i32 = arith.constant 0 : i32
    %c0_i32_0 = arith.constant 0 : i32
    return %c0_i32, %arg0 : i32, i32
  }
  func.func @transform_4(%arg0: i32, %arg1: i32) -> (i32, i32, i32) {
    %c0_i32 = arith.constant 0 : i32
    %c0_i32_0 = arith.constant 0 : i32
    return %arg1, %c0_i32, %arg0 : i32, i32, i32
  }
}

</mosaic_0001>

<bundles_post_ra>
// kernel: up_con.1
= control target key start
LH: loop header
LB: loop body
LE: loop exit
PB: predicated region body
PF: predicated region fallthrough
CT: control target
= control target key end

     0   :  { %9 = vsyncpa [#allocation4], 0  ;;  %s2202_s15 = smov 0   ;;  %s2204_s16 = smov 0   ;;  %s2287_s0 = inlined_call_operand.vmem [shape: f32[8,4], index: 0, kind: input, shape index: {}]   ;;  %s2288_s1 = inlined_call_operand.vmem [shape: f32[2,4,256], index: 1, kind: input, shape index: {}]   ;;  %s2289_s2 = inlined_call_operand.hbm [shape: bf16[256,1024], index: 2, kind: input, shape index: {}]   ;;  %s2290_s3 = inlined_call_operand.vmem [shape: f32[2,8,1024], index: 3, kind: input, shape index: {}]   ;;  %s2291_s4 = inlined_call_operand.vmem [shape: f32[2,16,1024], index: 4, kind: output, shape index: {}]  }
   0x1   :  { %s2206_s17 = smov 0  }
   0x2 LB: > { %s1414_s18 = sadd.s32 4294967295, %s2172_s17   ;;  %s24_s19 = sadd.s32 1, %s2168_s16  ;;  %s2172_s17 = sphi %s2206_s17, %s15_s17   ;;  %s2168_s16 = sphi %s2204_s16, %s2293_s16   ;;  %s2164_s15 = sphi %s2202_s15, %s2292_s15  }
   0x3   : > { %p25_p0 = scmp.ge.s32.totalorder %s24_s19, 2  ;;  %p1416_p1 = scmp.ge.s32.totalorder %s2172_s17, 1 }
   0x4   : > { %p133_p2 = scmp.lt.s32.totalorder %s2172_s17, 3  ;;  %p2085_p4 = scmp.eq.s32.totalorder %s1414_s18, 0 }
   0x5   : > { %s2295_s19 = smov (%p25_p0, %s24_s19), 0  ;;  %s150_s22 = sshll.u32 %s2289_s2, 4  ;;  %s151_s22 = int_to_ptr.hbm [resolvable:$true] %s150_s22 }
   0x6   : > { %p134_p3 = pnand %p1416_p1, %p133_p2  ;;  %s2174_s23 = smov [#allocation3]  }
   0x7   : > { %s152_s24 = sshll.u32 %s2174_s23, 4  ;;  %s2175_s25 = smov 512   ;;  %s153_s24 = int_to_ptr.vmem [resolvable:$true] %s152_s24 }
   0x8   : > { %p2081_p5 = pneg %p134_p3  ;;  %s2176_s26 = smov 32  }
   0x9   : > { %176 = sbr.rel (%p134_p3) target bundleno = 374 (0x176), region = 32 }
   0xa   : > { %p2082_p6 = pnand %p2085_p4, %p2081_p5 }
   0xc   : > { %2084 = dma.hbm_to_vmem [thread:$0]  (!%p2082_p6), %s151_s22, 16384, %s153_s24, [#allocation4], %s2175_s25, %s2175_s25, %s2176_s26  }
   0xe   : > { %2157 = dma.done.wait (%p2085_p4), [#allocation4], 16384  }
   0xf   : > { %2159 = vsyncadd (%p2085_p4), [#allocation4], 4294950912  ;;  %p205_p7 = scmp.lt.s32.totalorder %s2164_s15, 1  ;;  %s1948_s27 = sshll.u32 %s2164_s15, 6 }
  0x10   : > { %s227_s30 = scalar_lea.vmem %s2290_s3, %s1948_s27 }
  0x11   : > { %s2297_s15 = smov (!%p205_p7, %s2164_s15), 1  ;;  %v238_v0 = vld [vmem:[%s227_s30] sm:$0xff]  ;;  %v240_v1 = vld [vmem:[%s227_s30 + $0x8] sm:$0xff]  ;;  %v242_v2 = vld [vmem:[%s227_s30 + $0x10] sm:$0xff] }
  0x12   : > { %s1946_s5 = sshll.u32 %s2297_s15, 3  ;;  %s1947_s6 = sshll.u32 %s2297_s15, 7  ;;  %v244_v3 = vld [vmem:[%s227_s30 + $0x18] sm:$0xff]  ;;  %v246_v4 = vld [vmem:[%s227_s30 + $0x20] sm:$0xff]  ;;  %v248_v5 = vld [vmem:[%s227_s30 + $0x28] sm:$0xff] }
  0x13   : > { %s209_s9 = scalar_lea.vmem %s2288_s1, %s1946_s5  ;;  %s2233_s12 = scalar_lea.vmem %s2291_s4, %s1947_s6  ;;  %v250_v6 = vld [vmem:[%s227_s30 + $0x30] sm:$0xff]  ;;  %v252_v7 = vld [vmem:[%s227_s30 + $0x38] sm:$0xff] }
  0x14   : > { %239 = vst [vmem:[%s2233_s12] sm:$0xff] %v238_v0 }
  0x15   : > { %241 = vst [vmem:[%s2233_s12 + $0x8] sm:$0xff] %v240_v1 }
  0x16   : > { %243 = vst [vmem:[%s2233_s12 + $0x10] sm:$0xff] %v242_v2 }
  0x17   : > { %245 = vst [vmem:[%s2233_s12 + $0x18] sm:$0xff] %v244_v3 }
  0x18   : > { %247 = vst [vmem:[%s2233_s12 + $0x20] sm:$0xff] %v246_v4 }
  0x19   : > { %249 = vst [vmem:[%s2233_s12 + $0x28] sm:$0xff] %v248_v5 }
  0x1a   : > { %251 = vst [vmem:[%s2233_s12 + $0x30] sm:$0xff] %v250_v6 }
  0x1b   : > { %253 = vst [vmem:[%s2233_s12 + $0x38] sm:$0xff] %v252_v7 }
  0x1c   : > { %259 = vsyncadd [#allocation2], 1024  ;;  %v261_v8 = vld [vmem:[%s209_s9] sm:$0xff]  ;;  %v1657_v9 = vld [vmem:[#allocation3 + $0x1c0] sm:$0xf]  ;;  %vm270_vm0 = vcmask 1043456  }
  0x1d   : > { %263 = vst [vmem:[#allocation1] ss:$2 sm:$0xff] %v261_v8  ;;  %v2009_v10 = vld [vmem:[#allocation3 + $0x1dc] sm:$0xf0]  ;;  %v2005_v15 = vld [vmem:[#allocation3 + $0x1c4] sm:$0xf] }
  0x1e   : > { %v1658_v11 = vor.u32 %v2009_v10, %v1657_v9  ;;  %v1913_v12 = vld [vmem:[#allocation3 + $0x3c0] sm:$0xf]  ;;  %v1659_v16 = vld [vmem:[#allocation3 + $0x1e0] sm:$0xf0]  ;;  %v260_v21 = vld [vmem:[%s2287_s0] sm:$0xff]  ;;  %vm266_vm1 = vcmask 31744  }
  0x1f   : > { %v2073_v13 = vld [vmem:[#allocation3 + $0x3dc] sm:$0xf0]  ;;  %v2069_v17 = vld [vmem:[#allocation3 + $0x3c4] sm:$0xf]  ;;  %v1662_v28 = vor.u32 %v2005_v15, %v1659_v16 }
  0x20   : > { %v1914_v14 = vor.u32 %v2073_v13, %v1913_v12  ;;  %1085 = vmatpush.bf16.msra.mxu2 %v1658_v11  ;;  %v1915_v18 = vld [vmem:[#allocation3 + $0x3e0] sm:$0xf0]  ;;  %v1625_v19 = vld [vmem:[#allocation3 + $0x180] sm:$0xf] }
  0x21   : > { %v2001_v20 = vld [vmem:[#allocation3 + $0x19c] sm:$0xf0]  ;;  %v1997_v25 = vld [vmem:[#allocation3 + $0x184] sm:$0xf]  ;;  %v1918_v29 = vor.u32 %v2069_v17, %v1915_v18 }
  0x22   : > { %1098 = vmatpush.bf16.msra.mxu3 %v1914_v14  ;;  %v1626_v22 = vor.u32 %v2001_v20, %v1625_v19  ;;  %v1881_v23 = vld [vmem:[#allocation3 + $0x380] sm:$0xf]  ;;  %v1627_v26 = vld [vmem:[#allocation3 + $0x1a0] sm:$0xf0] }
  0x23   : > { %v2065_v24 = vld [vmem:[#allocation3 + $0x39c] sm:$0xf0]  ;;  %v2061_v30 = vld [vmem:[#allocation3 + $0x384] sm:$0xf]  ;;  %v1630_v41 = vor.u32 %v1997_v25, %v1627_v26  ;;  %v1665_v25 = vld [vmem:[#allocation3 + $0x1c8] sm:$0xf] }
  0x24   : > { %v1593_v27 = vld [vmem:[#allocation3 + $0x140] sm:$0xf]  ;;  %v1883_v31 = vld [vmem:[#allocation3 + $0x3a0] sm:$0xf0]  ;;  %1086 = vmatpush.bf16.msra.mxu2 %v1626_v22  ;;  %v1882_v35 = vor.u32 %v2065_v24, %v1881_v23  ;;  %v2010_v26 = vld [vmem:[#allocation3 + $0x1e4] sm:$0xf0] }
  0x25   : > { %v1993_v32 = vld [vmem:[#allocation3 + $0x15c] sm:$0xf0]  ;;  %v264_v33 = vld.sshfl [vmem:[#allocation1] sm:$0xff pattern:$0x75316420]  ;;  %v1886_v42 = vor.u32 %v2061_v30, %v1883_v31 }
  0x26   : > { %v265_v34 = vld.sshfl [vmem:[#allocation1 + $0x8] sm:$0xff pattern:$0x75316420]  ;;  %v1594_v36 = vor.u32 %v1993_v32, %v1593_v27  ;;  %1427 = vmatpush.msk.msra.mxu0 %vm270_vm0, %v264_v33  ;;  %1099 = vmatpush.bf16.msra.mxu3 %v1882_v35 }
  0x27   : > { %1429 = vmatpush.msk.msra.mxu1 %vm270_vm0, %v265_v34  ;;  %v1849_v37 = vld [vmem:[#allocation3 + $0x340] sm:$0xf]  ;;  %1428 = vmatmul.msk.f32.vlgmr.msra.gmra.mxu0 %vm266_vm1, %v260_v21  ;;  %v1989_v43 = vld [vmem:[#allocation3 + $0x144] sm:$0xf] }
  0x28   : > { %v2057_v38 = vld [vmem:[#allocation3 + $0x35c] sm:$0xf0]  ;;  %1430 = vmatmul.msk.f32.vlgmr.msra.gmra.mxu1 %vm266_vm1, %v260_v21  ;;  %1111 = vmatpush.bf16.msrb.mxu0 %v1662_v28  ;;  %v1595_v44 = vld [vmem:[#allocation3 + $0x160] sm:$0xf0] }
  0x29   : > { %v1561_v39 = vld [vmem:[#allocation3 + $0x100] sm:$0xf]  ;;  %1124 = vmatpush.bf16.msrb.mxu1 %v1918_v29  ;;  %1087 = vmatpush.bf16.msra.mxu2 %v1594_v36  ;;  %v1850_v45 = vor.u32 %v2057_v38, %v1849_v37  ;;  %v2053_v46 = vld [vmem:[#allocation3 + $0x344] sm:$0xf]  ;;  %v1598_v53 = vor.u32 %v1989_v43, %v1595_v44  ;;  %v1666_v37 = vor.u32 %v2010_v26, %v1665_v25  ;;  %v1921_v38 = vld [vmem:[#allocation3 + $0x3c8] sm:$0xf] }
  0x2a   : > { %v1985_v40 = vld [vmem:[#allocation3 + $0x11c] sm:$0xf0]  ;;  %v1851_v47 = vld [vmem:[#allocation3 + $0x360] sm:$0xf0]  ;;  %v2046_v26 = vld [vmem:[#allocation3 + $0x30c] sm:$0xf] }
  0x2b   : > { %v1562_v48 = vor.u32 %v1985_v40, %v1561_v39  ;;  %v1817_v49 = vld [vmem:[#allocation3 + $0x300] sm:$0xf]  ;;  %v1854_v54 = vor.u32 %v2053_v46, %v1851_v47  ;;  %v1981_v55 = vld [vmem:[#allocation3 + $0x104] sm:$0xf]  ;;  %1100 = vmatpush.bf16.msra.mxu3 %v1850_v45  ;;  %v2074_v39 = vld [vmem:[#allocation3 + $0x3e4] sm:$0xf0] }
  0x2c   : > { %v2049_v50 = vld [vmem:[#allocation3 + $0x31c] sm:$0xf0]  ;;  %1112 = vmatpush.bf16.msrb.mxu0 %v1630_v41  ;;  %v1563_v56 = vld [vmem:[#allocation3 + $0x120] sm:$0xf0]  ;;  %v1633_v40 = vld [vmem:[#allocation3 + $0x188] sm:$0xf] }
  0x2d   : > { %v1529_v51 = vld [vmem:[#allocation3 + $0xc0] sm:$0xf]  ;;  %1125 = vmatpush.bf16.msrb.mxu1 %v1886_v42  ;;  %1088 = vmatpush.bf16.msra.mxu2 %v1562_v48  ;;  %v1818_v57 = vor.u32 %v2049_v50, %v1817_v49  ;;  %v2045_v58 = vld [vmem:[#allocation3 + $0x304] sm:$0xf]  ;;  %v1566_v1 = vor.u32 %v1981_v55, %v1563_v56  ;;  %v2002_v41 = vld [vmem:[#allocation3 + $0x1a4] sm:$0xf0] }
  0x2e   : > { %v1977_v52 = vld [vmem:[#allocation3 + $0xdc] sm:$0xf0]  ;;  %v1819_v59 = vld [vmem:[#allocation3 + $0x320] sm:$0xf0]  ;;  %v2006_v49 = vld [vmem:[#allocation3 + $0x1cc] sm:$0xf] }
  0x2f   : > { %v1530_v60 = vor.u32 %v1977_v52, %v1529_v51  ;;  %v1785_v61 = vld [vmem:[#allocation3 + $0x2c0] sm:$0xf]  ;;  %v1822_v2 = vor.u32 %v2045_v58, %v1819_v59  ;;  %v1973_v3 = vld [vmem:[#allocation3 + $0xc4] sm:$0xf]  ;;  %1101 = vmatpush.bf16.msra.mxu3 %v1818_v57  ;;  %v1667_v50 = vld [vmem:[#allocation3 + $0x1e8] sm:$0xf0]  ;;  %v1922_v51 = vor.u32 %v2074_v39, %v1921_v38 }
  0x30   : > { %v2041_v62 = vld [vmem:[#allocation3 + $0x2dc] sm:$0xf0]  ;;  %1113 = vmatpush.bf16.msrb.mxu0 %v1598_v53  ;;  %v1531_v4 = vld [vmem:[#allocation3 + $0xe0] sm:$0xf0]  ;;  %v2070_v52 = vld [vmem:[#allocation3 + $0x3cc] sm:$0xf] }
  0x31   : > { %v1497_v63 = vld [vmem:[#allocation3 + $0x80] sm:$0xf]  ;;  %1126 = vmatpush.bf16.msrb.mxu1 %v1854_v54  ;;  %1089 = vmatpush.bf16.msra.mxu2 %v1530_v60  ;;  %v1786_v5 = vor.u32 %v2041_v62, %v1785_v61  ;;  %v2037_v6 = vld [vmem:[#allocation3 + $0x2c4] sm:$0xf]  ;;  %v1534_v13 = vor.u32 %v1973_v3, %v1531_v4  ;;  %v1923_v53 = vld [vmem:[#allocation3 + $0x3e8] sm:$0xf0]  ;;  %v1634_v54 = vor.u32 %v2002_v41, %v1633_v40 }
  0x32   : > { %v1969_v0 = vld [vmem:[#allocation3 + $0x9c] sm:$0xf0]  ;;  %v1787_v7 = vld [vmem:[#allocation3 + $0x2e0] sm:$0xf0]  ;;  %v1889_v55 = vld [vmem:[#allocation3 + $0x388] sm:$0xf]  ;;  %v1670_v61 = vor.u32 %v2006_v49, %v1667_v50  ;;  %v1926_v62 = vor.u32 %v2070_v52, %v1923_v53 }
  0x33   : > { %v1498_v8 = vor.u32 %v1969_v0, %v1497_v63  ;;  %v1753_v9 = vld [vmem:[#allocation3 + $0x280] sm:$0xf]  ;;  %v1790_v14 = vor.u32 %v2037_v6, %v1787_v7  ;;  %v1965_v15 = vld [vmem:[#allocation3 + $0x84] sm:$0xf]  ;;  %1102 = vmatpush.bf16.msra.mxu3 %v1786_v5  ;;  %v2066_v56 = vld [vmem:[#allocation3 + $0x3a4] sm:$0xf0] }
  0x34   : > { %v2033_v10 = vld [vmem:[#allocation3 + $0x29c] sm:$0xf0]  ;;  %1114 = vmatpush.bf16.msrb.mxu0 %v1566_v1  ;;  %v1499_v16 = vld [vmem:[#allocation3 + $0xa0] sm:$0xf0]  ;;  %v1601_v57 = vld [vmem:[#allocation3 + $0x148] sm:$0xf]  ;;  %v1890_v1 = vor.u32 %v2066_v56, %v1889_v55 }
  0x35   : > { %v1465_v11 = vld [vmem:[#allocation3 + $0x40] sm:$0xf]  ;;  %1127 = vmatpush.bf16.msrb.mxu1 %v1822_v2  ;;  %1090 = vmatpush.bf16.msra.mxu2 %v1498_v8  ;;  %v1754_v17 = vor.u32 %v2033_v10, %v1753_v9  ;;  %v2029_v18 = vld [vmem:[#allocation3 + $0x284] sm:$0xf]  ;;  %v1502_v27 = vor.u32 %v1965_v15, %v1499_v16  ;;  %v1994_v58 = vld [vmem:[#allocation3 + $0x164] sm:$0xf0] }
  0x36   : > { %v1961_v12 = vld [vmem:[#allocation3 + $0x5c] sm:$0xf0]  ;;  %v1755_v19 = vld [vmem:[#allocation3 + $0x2a0] sm:$0xf0]  ;;  %v1998_v63 = vld [vmem:[#allocation3 + $0x18c] sm:$0xf]  ;;  %v1602_v4 = vor.u32 %v1994_v58, %v1601_v57 }
  0x37   : > { %v1466_v20 = vor.u32 %v1961_v12, %v1465_v11  ;;  %v1721_v21 = vld [vmem:[#allocation3 + $0x240] sm:$0xf]  ;;  %v1758_v28 = vor.u32 %v2029_v18, %v1755_v19  ;;  %v1957_v29 = vld [vmem:[#allocation3 + $0x44] sm:$0xf]  ;;  %1103 = vmatpush.bf16.msra.mxu3 %v1754_v17  ;;  %v1635_v0 = vld [vmem:[#allocation3 + $0x1a8] sm:$0xf0] }
  0x38   : > { %v2025_v22 = vld [vmem:[#allocation3 + $0x25c] sm:$0xf0]  ;;  %1115 = vmatpush.bf16.msrb.mxu0 %v1534_v13  ;;  %v1467_v31 = vld [vmem:[#allocation3 + $0x60] sm:$0xf0]  ;;  %v2062_v2 = vld [vmem:[#allocation3 + $0x38c] sm:$0xf]  ;;  %v1638_v9 = vor.u32 %v1998_v63, %v1635_v0 }
  0x39   : > { %v1433_v23 = vld [vmem:[#allocation3] sm:$0xf]  ;;  %1128 = vmatpush.bf16.msrb.mxu1 %v1790_v14  ;;  %1091 = vmatpush.bf16.msra.mxu2 %v1466_v20  ;;  %v1722_v30 = vor.u32 %v2025_v22, %v1721_v21  ;;  %v2021_v32 = vld [vmem:[#allocation3 + $0x244] sm:$0xf]  ;;  %v1470_v42 = vor.u32 %v1957_v29, %v1467_v31  ;;  %v1891_v3 = vld [vmem:[#allocation3 + $0x3a8] sm:$0xf0] }
  0x3a   : > { %v1953_v24 = vld [vmem:[#allocation3 + $0x1c] sm:$0xf0]  ;;  %v1723_v33 = vld [vmem:[#allocation3 + $0x260] sm:$0xf0]  ;;  %v1857_v5 = vld [vmem:[#allocation3 + $0x348] sm:$0xf]  ;;  %v1894_v10 = vor.u32 %v2062_v2, %v1891_v3 }
  0x3b   : > { %v1434_v34 = vor.u32 %v1953_v24, %v1433_v23  ;;  %v1689_v35 = vld [vmem:[#allocation3 + $0x200] sm:$0xf]  ;;  %v1726_v43 = vor.u32 %v2021_v32, %v1723_v33  ;;  %v1949_v44 = vld [vmem:[#allocation3 + $0x4] sm:$0xf]  ;;  %1104 = vmatpush.bf16.msra.mxu3 %v1722_v30  ;;  %v2058_v6 = vld [vmem:[#allocation3 + $0x364] sm:$0xf0] }
  0x3c   : > { %v2017_v36 = vld [vmem:[#allocation3 + $0x21c] sm:$0xf0]  ;;  %1116 = vmatpush.bf16.msrb.mxu0 %v1502_v27  ;;  %v1435_v45 = vld [vmem:[#allocation3 + $0x20] sm:$0xf0]  ;;  %v1569_v7 = vld [vmem:[#allocation3 + $0x108] sm:$0xf]  ;;  %v1858_v13 = vor.u32 %v2058_v6, %v1857_v5 }
  0x3d   : > { %1129 = vmatpush.bf16.msrb.mxu1 %v1758_v28  ;;  %v2013_v46 = vld [vmem:[#allocation3 + $0x204] sm:$0xf]  ;;  %1092 = vmatpush.bf16.msra.mxu2 %v1434_v34  ;;  %v1690_v47 = vor.u32 %v2017_v36, %v1689_v35  ;;  %v1438_v59 = vor.u32 %v1949_v44, %v1435_v45  ;;  %v1986_v8 = vld [vmem:[#allocation3 + $0x124] sm:$0xf0]  ;;  %v1990_v11 = vld [vmem:[#allocation3 + $0x14c] sm:$0xf] }
  0x3e   : > { %v1691_v48 = vld [vmem:[#allocation3 + $0x220] sm:$0xf0]  ;;  %v1603_v12 = vld [vmem:[#allocation3 + $0x168] sm:$0xf0]  ;;  %v1570_v16 = vor.u32 %v1986_v8, %v1569_v7  ;;  %v1825_v17 = vld [vmem:[#allocation3 + $0x308] sm:$0xf] }
  0x3f   : > { %v1694_v60 = vor.u32 %v2013_v46, %v1691_v48  ;;  %1105 = vmatpush.bf16.msra.mxu3 %v1690_v47  ;;  %v2054_v14 = vld [vmem:[#allocation3 + $0x34c] sm:$0xf]  ;;  %v2050_v18 = vld [vmem:[#allocation3 + $0x324] sm:$0xf0]  ;;  %v1606_v21 = vor.u32 %v1990_v11, %v1603_v12  ;;  %v1673_v12 = vld [vmem:[#allocation3 + $0x1d0] sm:$0xf] }
  0x40   : > { %1117 = vmatpush.bf16.msrb.mxu0 %v1470_v42  ;;  %v1859_v15 = vld [vmem:[#allocation3 + $0x368] sm:$0xf0]  ;;  %v1537_v19 = vld [vmem:[#allocation3 + $0xc8] sm:$0xf]  ;;  %v1826_v25 = vor.u32 %v2050_v18, %v1825_v17  ;;  %v1675_v17 = vld [vmem:[#allocation3 + $0x1f0] sm:$0xf0] }
  0x41   : > { %1137 = vmatpush.bf16.msrb.mxu2 %v1666_v37  ;;  %1130 = vmatpush.bf16.msrb.mxu1 %v1726_v43  ;;  %v1978_v20 = vld [vmem:[#allocation3 + $0xe4] sm:$0xf0]  ;;  %v1862_v22 = vor.u32 %v2054_v14, %v1859_v15  ;;  %v1982_v23 = vld [vmem:[#allocation3 + $0x10c] sm:$0xf]  ;;  %v1929_v14 = vld [vmem:[#allocation3 + $0x3d0] sm:$0xf] }
  0x42   : > { %v1571_v24 = vld [vmem:[#allocation3 + $0x128] sm:$0xf0]  ;;  %v1538_v28 = vor.u32 %v1978_v20, %v1537_v19  ;;  %v1793_v29 = vld [vmem:[#allocation3 + $0x2c8] sm:$0xf]  ;;  %v2075_v15 = vld [vmem:[#allocation3 + $0x3ec] sm:$0xf0] }
  0x43   : > { %1150 = vmatpush.bf16.msrb.mxu3 %v1922_v51  ;;  %v1827_v27 = vld [vmem:[#allocation3 + $0x328] sm:$0xf0]  ;;  %v2042_v30 = vld [vmem:[#allocation3 + $0x2e4] sm:$0xf0]  ;;  %v1574_v33 = vor.u32 %v1982_v23, %v1571_v24  ;;  %v2071_v18 = vld [vmem:[#allocation3 + $0x3d4] sm:$0xf] }
  0x44   : > { %1118 = vmatpush.bf16.msrb.mxu0 %v1438_v59  ;;  %v1505_v31 = vld [vmem:[#allocation3 + $0x88] sm:$0xf]  ;;  %v1830_v34 = vor.u32 %v2046_v26, %v1827_v27  ;;  %v1974_v35 = vld [vmem:[#allocation3 + $0xcc] sm:$0xf]  ;;  %v1794_v37 = vor.u32 %v2042_v30, %v1793_v29  ;;  %v1931_v19 = vld [vmem:[#allocation3 + $0x3f0] sm:$0xf0] }
  0x45   : > { %1138 = vmatpush.bf16.msrb.mxu2 %v1634_v54  ;;  %1131 = vmatpush.bf16.msrb.mxu1 %v1694_v60  ;;  %v1970_v32 = vld [vmem:[#allocation3 + $0xa4] sm:$0xf0]  ;;  %v1539_v36 = vld [vmem:[#allocation3 + $0xe8] sm:$0xf0]  ;;  %v1641_v26 = vld [vmem:[#allocation3 + $0x190] sm:$0xf]  ;;  %v1934_v29 = vor.u32 %v2071_v18, %v1931_v19 }
  0x46   : > { %v2038_v38 = vld [vmem:[#allocation3 + $0x2cc] sm:$0xf]  ;;  %v1506_v40 = vor.u32 %v1970_v32, %v1505_v31  ;;  %v1761_v41 = vld [vmem:[#allocation3 + $0x288] sm:$0xf]  ;;  %v1542_v45 = vor.u32 %v1974_v35, %v1539_v36  ;;  %v2003_v27 = vld [vmem:[#allocation3 + $0x1ac] sm:$0xf0] }
  0x47   : > { %1151 = vmatpush.bf16.msrb.mxu3 %v1890_v1  ;;  %v1795_v39 = vld [vmem:[#allocation3 + $0x2e8] sm:$0xf0]  ;;  %v2034_v42 = vld [vmem:[#allocation3 + $0x2a4] sm:$0xf0]  ;;  %v1897_v30 = vld [vmem:[#allocation3 + $0x390] sm:$0xf]  ;;  %v1642_v36 = vor.u32 %v2003_v27, %v1641_v26 }
  0x48   : > { %1163 = vmatpush.bf16.msra.mxu0 %v1670_v61  ;;  %v1473_v43 = vld [vmem:[#allocation3 + $0x48] sm:$0xf]  ;;  %v1798_v46 = vor.u32 %v2038_v38, %v1795_v39  ;;  %v1966_v47 = vld [vmem:[#allocation3 + $0x8c] sm:$0xf]  ;;  %v1762_v48 = vor.u32 %v2034_v42, %v1761_v41  ;;  %v2067_v31 = vld [vmem:[#allocation3 + $0x3ac] sm:$0xf0] }
  0x49   : > { %1176 = vmatpush.bf16.msra.mxu1 %v1926_v62  ;;  %1139 = vmatpush.bf16.msrb.mxu2 %v1602_v4  ;;  %v1962_v44 = vld [vmem:[#allocation3 + $0x64] sm:$0xf0]  ;;  %v1507_v49 = vld [vmem:[#allocation3 + $0xa8] sm:$0xf0]  ;;  %v1999_v32 = vld [vmem:[#allocation3 + $0x194] sm:$0xf] }
  0x4a   : > { %v2030_v50 = vld [vmem:[#allocation3 + $0x28c] sm:$0xf]  ;;  %v1474_v52 = vor.u32 %v1962_v44, %v1473_v43  ;;  %v1729_v53 = vld [vmem:[#allocation3 + $0x248] sm:$0xf]  ;;  %v1510_v55 = vor.u32 %v1966_v47, %v1507_v49  ;;  %v1899_v35 = vld [vmem:[#allocation3 + $0x3b0] sm:$0xf0] }
  0x4b   : > { %1152 = vmatpush.bf16.msrb.mxu3 %v1858_v13  ;;  %v1763_v51 = vld [vmem:[#allocation3 + $0x2a8] sm:$0xf0]  ;;  %v2026_v54 = vld [vmem:[#allocation3 + $0x264] sm:$0xf0]  ;;  %v2011_v13 = vld [vmem:[#allocation3 + $0x1ec] sm:$0xf0] }
  0x4c   : > { %1164 = vmatpush.bf16.msra.mxu0 %v1638_v9  ;;  %v1766_v56 = vor.u32 %v2030_v50, %v1763_v51  ;;  %v1958_v57 = vld [vmem:[#allocation3 + $0x4c] sm:$0xf]  ;;  %v1730_v58 = vor.u32 %v2026_v54, %v1729_v53  ;;  %v1441_v0 = vld [vmem:[#allocation3 + $0x8] sm:$0xf]  ;;  %v1674_v24 = vor.u32 %v2011_v13, %v1673_v12  ;;  %v1609_v38 = vld [vmem:[#allocation3 + $0x150] sm:$0xf] }
  0x4d   : > { %1177 = vmatpush.bf16.msra.mxu1 %v1894_v10  ;;  %1140 = vmatpush.bf16.msrb.mxu2 %v1570_v16  ;;  %v1475_v59 = vld [vmem:[#allocation3 + $0x68] sm:$0xf0]  ;;  %v1954_v1 = vld [vmem:[#allocation3 + $0x24] sm:$0xf0]  ;;  %v2007_v16 = vld [vmem:[#allocation3 + $0x1d4] sm:$0xf] }
  0x4e   : > { %v2022_v60 = vld [vmem:[#allocation3 + $0x24c] sm:$0xf]  ;;  %v1478_v62 = vor.u32 %v1958_v57, %v1475_v59  ;;  %v1697_v2 = vld [vmem:[#allocation3 + $0x208] sm:$0xf]  ;;  %v1442_v3 = vor.u32 %v1954_v1, %v1441_v0  ;;  %v1995_v39 = vld [vmem:[#allocation3 + $0x16c] sm:$0xf0] }
  0x4f   : > { %1153 = vmatpush.bf16.msrb.mxu3 %v1826_v25  ;;  %v1731_v61 = vld [vmem:[#allocation3 + $0x268] sm:$0xf0]  ;;  %v2018_v4 = vld [vmem:[#allocation3 + $0x224] sm:$0xf0]  ;;  %v1930_v25 = vor.u32 %v2075_v15, %v1929_v14  ;;  %v1865_v42 = vld [vmem:[#allocation3 + $0x350] sm:$0xf] }
  0x50   : > { %1165 = vmatpush.bf16.msra.mxu0 %v1606_v21  ;;  %v1734_v63 = vor.u32 %v2022_v60, %v1731_v61  ;;  %v1950_v5 = vld [vmem:[#allocation3 + $0xc] sm:$0xf]  ;;  %v1698_v7 = vor.u32 %v2018_v4, %v1697_v2  ;;  %v2059_v43 = vld [vmem:[#allocation3 + $0x36c] sm:$0xf0]  ;;  %v1991_v44 = vld [vmem:[#allocation3 + $0x154] sm:$0xf] }
  0x51   : > { %1178 = vmatpush.bf16.msra.mxu1 %v1862_v22  ;;  %1141 = vmatpush.bf16.msrb.mxu2 %v1538_v28  ;;  %v1443_v6 = vld [vmem:[#allocation3 + $0x28] sm:$0xf0]  ;;  %v1678_v28 = vor.u32 %v2007_v16, %v1675_v17  ;;  %v1867_v47 = vld [vmem:[#allocation3 + $0x370] sm:$0xf0]  ;;  %v1866_v49 = vor.u32 %v2059_v43, %v1865_v42  ;;  %v1577_v50 = vld [vmem:[#allocation3 + $0x110] sm:$0xf] }
  0x52   : > { %v1446_v8 = vor.u32 %v1950_v5, %v1443_v6  ;;  %v2014_v9 = vld [vmem:[#allocation3 + $0x20c] sm:$0xf]  ;;  %v1987_v51 = vld [vmem:[#allocation3 + $0x12c] sm:$0xf0]  ;;  %v1579_v57 = vld [vmem:[#allocation3 + $0x130] sm:$0xf0] }
  0x53   : > { %1154 = vmatpush.bf16.msrb.mxu3 %v1794_v37  ;;  %v1699_v10 = vld [vmem:[#allocation3 + $0x228] sm:$0xf0]  ;;  %v1898_v37 = vor.u32 %v2067_v31, %v1897_v30  ;;  %v1833_v54 = vld [vmem:[#allocation3 + $0x310] sm:$0xf]  ;;  %v1835_v59 = vld [vmem:[#allocation3 + $0x330] sm:$0xf0]  ;;  %v1578_v60 = vor.u32 %v1987_v51, %v1577_v50 }
  0x54   : > { %1166 = vmatpush.bf16.msra.mxu0 %v1574_v33  ;;  %v1702_v11 = vor.u32 %v2014_v9, %v1699_v10  ;;  %v1643_v33 = vld [vmem:[#allocation3 + $0x1b0] sm:$0xf0]  ;;  %v1801_v2 = vld [vmem:[#allocation3 + $0x2d0] sm:$0xf]  ;;  %v2008_v50 = vld [vmem:[#allocation3 + $0x1dc] sm:$0xf] }
  0x55   : > { %1179 = vmatpush.bf16.msra.mxu1 %v1830_v34  ;;  %1142 = vmatpush.bf16.msrb.mxu2 %v1506_v40  ;;  %v2063_v34 = vld [vmem:[#allocation3 + $0x394] sm:$0xf]  ;;  %v1646_v40 = vor.u32 %v1999_v32, %v1643_v33  ;;  %v1513_v10 = vld [vmem:[#allocation3 + $0x90] sm:$0xf] }
  0x56   : > { %v1902_v41 = vor.u32 %v2063_v34, %v1899_v35  ;;  %v1975_v4 = vld [vmem:[#allocation3 + $0xd4] sm:$0xf]  ;;  %v1769_v14 = vld [vmem:[#allocation3 + $0x290] sm:$0xf] }
  0x57   : > { %1155 = vmatpush.bf16.msrb.mxu3 %v1762_v48  ;;  %v1610_v48 = vor.u32 %v1995_v39, %v1609_v38  ;;  %v1547_v5 = vld [vmem:[#allocation3 + $0xf0] sm:$0xf0]  ;;  %v2035_v15 = vld [vmem:[#allocation3 + $0x2ac] sm:$0xf0] }
  0x58   : > { %1167 = vmatpush.bf16.msra.mxu0 %v1542_v45  ;;  %v1611_v45 = vld [vmem:[#allocation3 + $0x170] sm:$0xf0]  ;;  %v1550_v12 = vor.u32 %v1975_v4, %v1547_v5  ;;  %v1449_v34 = vld [vmem:[#allocation3 + $0x10] sm:$0xf]  ;;  %v2064_v4 = vld [vmem:[#allocation3 + $0x39c] sm:$0xf] }
  0x59   : > { %1180 = vmatpush.bf16.msra.mxu1 %v1798_v46  ;;  %1143 = vmatpush.bf16.msrb.mxu2 %v1474_v52  ;;  %v2055_v46 = vld [vmem:[#allocation3 + $0x354] sm:$0xf]  ;;  %v1614_v52 = vor.u32 %v1991_v44, %v1611_v45  ;;  %v1705_v38 = vld [vmem:[#allocation3 + $0x210] sm:$0xf]  ;;  %v1907_v5 = vld [vmem:[#allocation3 + $0x3b8] sm:$0xf0] }
  0x5a   : > { %v1870_v53 = vor.u32 %v2055_v46, %v1867_v47  ;;  %v2039_v6 = vld [vmem:[#allocation3 + $0x2d4] sm:$0xf]  ;;  %v2019_v39 = vld [vmem:[#allocation3 + $0x22c] sm:$0xf0]  ;;  %v1681_v46 = vld [vmem:[#allocation3 + $0x1d8] sm:$0xf] }
  0x5b   : > { %1156 = vmatpush.bf16.msrb.mxu3 %v1730_v58  ;;  %v2047_v58 = vld [vmem:[#allocation3 + $0x314] sm:$0xf]  ;;  %v2012_v47 = vld [vmem:[#allocation3 + $0x1f4] sm:$0xf0] }
  0x5c   : > { %1168 = vmatpush.bf16.msra.mxu0 %v1510_v55  ;;  %v2051_v55 = vld [vmem:[#allocation3 + $0x32c] sm:$0xf0]  ;;  %v1838_v1 = vor.u32 %v2047_v58, %v1835_v59  ;;  %v1967_v16 = vld [vmem:[#allocation3 + $0x94] sm:$0xf]  ;;  %v1682_v58 = vor.u32 %v2012_v47, %v1681_v46  ;;  %v1521_v46 = vld [vmem:[#allocation3 + $0x98] sm:$0xf] }
  0x5d   : > { %1181 = vmatpush.bf16.msra.mxu1 %v1766_v56  ;;  %1144 = vmatpush.bf16.msrb.mxu2 %v1442_v3  ;;  %v1983_v56 = vld [vmem:[#allocation3 + $0x114] sm:$0xf]  ;;  %v1834_v61 = vor.u32 %v2051_v55, %v1833_v54  ;;  %v2043_v3 = vld [vmem:[#allocation3 + $0x2ec] sm:$0xf0]  ;;  %v2072_v54 = vld [vmem:[#allocation3 + $0x3dc] sm:$0xf] }
  0x5e   : > { %v1582_v0 = vor.u32 %v1983_v56, %v1579_v57  ;;  %v1802_v9 = vor.u32 %v2043_v3, %v1801_v2  ;;  %v1515_v17 = vld [vmem:[#allocation3 + $0xb0] sm:$0xf0]  ;;  %v1939_v55 = vld [vmem:[#allocation3 + $0x3f8] sm:$0xf0]  ;;  %v1972_v47 = vld [vmem:[#allocation3 + $0xb4] sm:$0xf0] }
  0x5f   : > { %1157 = vmatpush.bf16.msrb.mxu3 %v1698_v7  ;;  %v1803_v7 = vld [vmem:[#allocation3 + $0x2f0] sm:$0xf0]  ;;  %v1518_v26 = vor.u32 %v1967_v16, %v1515_v17  ;;  %v2000_v2 = vld [vmem:[#allocation3 + $0x19c] sm:$0xf] }
  0x60   : > { %1169 = vmatpush.bf16.msra.mxu0 %v1478_v62  ;;  %v1545_v62 = vld [vmem:[#allocation3 + $0xd0] sm:$0xf]  ;;  %v1806_v13 = vor.u32 %v2039_v6, %v1803_v7  ;;  %v2031_v18 = vld [vmem:[#allocation3 + $0x294] sm:$0xf]  ;;  %v1651_v3 = vld [vmem:[#allocation3 + $0x1b8] sm:$0xf0] }
  0x61   : > { %1182 = vmatpush.bf16.msra.mxu1 %v1734_v63  ;;  %v1979_v63 = vld [vmem:[#allocation3 + $0xec] sm:$0xf0]  ;;  %v1771_v19 = vld [vmem:[#allocation3 + $0x2b0] sm:$0xf0]  ;;  %v2056_v16 = vld [vmem:[#allocation3 + $0x35c] sm:$0xf] }
  0x62   : > { %v1774_v27 = vor.u32 %v2031_v18, %v1771_v19  ;;  %v1959_v30 = vld [vmem:[#allocation3 + $0x54] sm:$0xf]  ;;  %v1875_v17 = vld [vmem:[#allocation3 + $0x378] sm:$0xf0] }
  0x63   : > { %v1483_v31 = vld [vmem:[#allocation3 + $0x70] sm:$0xf0] }
  0x64   : > { %1170 = vmatpush.bf16.msra.mxu0 %v1446_v8  ;;  %v1546_v8 = vor.u32 %v1979_v63, %v1545_v62  ;;  %v2023_v32 = vld [vmem:[#allocation3 + $0x254] sm:$0xf]  ;;  %v1942_v63 = vor.u32 %v2072_v54, %v1939_v55  ;;  %v2032_v54 = vld [vmem:[#allocation3 + $0x29c] sm:$0xf] }
  0x65   : > { %1183 = vmatpush.bf16.msra.mxu1 %v1702_v11  ;;  %v1971_v11 = vld [vmem:[#allocation3 + $0xac] sm:$0xf0]  ;;  %v1739_v33 = vld [vmem:[#allocation3 + $0x270] sm:$0xf0]  ;;  %v1779_v55 = vld [vmem:[#allocation3 + $0x2b8] sm:$0xf0] }
  0x66   : > { %v1951_v42 = vld [vmem:[#allocation3 + $0x14] sm:$0xf] }
  0x67   : > { %v1451_v43 = vld [vmem:[#allocation3 + $0x30] sm:$0xf0] }
  0x68   : > { %v2015_v44 = vld [vmem:[#allocation3 + $0x214] sm:$0xf]  ;;  %v1454_v56 = vor.u32 %v1951_v42, %v1451_v43  ;;  %v2040_v42 = vld [vmem:[#allocation3 + $0x2dc] sm:$0xf] }
  0x69   : > { %v1707_v45 = vld [vmem:[#allocation3 + $0x230] sm:$0xf0]  ;;  %v1811_v43 = vld [vmem:[#allocation3 + $0x2f8] sm:$0xf0] }
  0x6a   : > { %v1710_v57 = vor.u32 %v2015_v44, %v1707_v45 }
  0xa4   : > { %v292_v20 = vpop.f32.mrf.mxu0 }
  0xa5   : > { %v312_v21 = vpop.f32.mrf.mxu1  ;;  %v2250_v22 = vpack.c.bf16 %v292_v20, %v292_v20  ;;  %v1514_v20 = vor.u32 %v1971_v11, %v1513_v10  ;;  %v1654_v10 = vor.u32 %v2000_v2, %v1651_v3  ;;  %v1910_v11 = vor.u32 %v2064_v4, %v1907_v5  ;;  %v2024_v2 = vld [vmem:[#allocation3 + $0x25c] sm:$0xf] }
  0xa6   : > { %v2252_v23 = vpack.c.bf16 %v312_v21, %v312_v21  ;;  %v1770_v21 = vor.u32 %v2035_v15, %v1769_v14  ;;  %v1992_v14 = vld [vmem:[#allocation3 + $0x15c] sm:$0xf] }
  0xa7   : > { %1093 = vmatmul.bf16.vlgmr.msra.gmra.mxu2 %v2250_v22  ;;  %1119 = vmatmul.bf16.vlgmr.msrb.gmra.mxu0 %v2250_v22  ;;  %v1619_v15 = vld [vmem:[#allocation3 + $0x178] sm:$0xf0] }
  0xa8   : > { %1106 = vmatmul.bf16.vlgmr.msra.gmra.mxu3 %v2252_v23  ;;  %1132 = vmatmul.bf16.vlgmr.msrb.gmra.mxu1 %v2252_v23  ;;  %v1747_v3 = vld [vmem:[#allocation3 + $0x278] sm:$0xf0] }
  0xa9   : > { %1189 = vmatpush.bf16.msra.mxu2 %v1674_v24  ;;  %1202 = vmatpush.bf16.msra.mxu3 %v1930_v25  ;;  %v1481_v24 = vld [vmem:[#allocation3 + $0x50] sm:$0xf] }
  0xaa   : > { %1215 = vmatpush.bf16.msrb.mxu0 %v1678_v28  ;;  %1228 = vmatpush.bf16.msrb.mxu1 %v1934_v29  ;;  %v1963_v25 = vld [vmem:[#allocation3 + $0x6c] sm:$0xf0] }
  0xab   : > { %v1737_v28 = vld [vmem:[#allocation3 + $0x250] sm:$0xf]  ;;  %v1482_v35 = vor.u32 %v1963_v25, %v1481_v24  ;;  %v1622_v24 = vor.u32 %v1992_v14, %v1619_v15  ;;  %v1878_v25 = vor.u32 %v2056_v16, %v1875_v17  ;;  %v2016_v14 = vld [vmem:[#allocation3 + $0x21c] sm:$0xf] }
  0xac   : > { %v2027_v29 = vld [vmem:[#allocation3 + $0x26c] sm:$0xf0]  ;;  %v1715_v15 = vld [vmem:[#allocation3 + $0x238] sm:$0xf0] }
  0xad   : > { %1190 = vmatpush.bf16.msra.mxu2 %v1642_v36  ;;  %1203 = vmatpush.bf16.msra.mxu3 %v1898_v37  ;;  %v1738_v36 = vor.u32 %v2027_v29, %v1737_v28  ;;  %v1955_v37 = vld [vmem:[#allocation3 + $0x2c] sm:$0xf0]  ;;  %v1984_v28 = vld [vmem:[#allocation3 + $0x11c] sm:$0xf] }
  0xae   : > { %1216 = vmatpush.bf16.msrb.mxu0 %v1646_v40  ;;  %1229 = vmatpush.bf16.msrb.mxu1 %v1902_v41  ;;  %v1486_v40 = vor.u32 %v1959_v30, %v1483_v31  ;;  %v1742_v41 = vor.u32 %v2023_v32, %v1739_v33  ;;  %v1450_v51 = vor.u32 %v1955_v37, %v1449_v34  ;;  %v1587_v29 = vld [vmem:[#allocation3 + $0x138] sm:$0xf0]  ;;  %v1553_v34 = vld [vmem:[#allocation3 + $0xd8] sm:$0xf] }
  0xaf   : > { %v2048_v30 = vld [vmem:[#allocation3 + $0x31c] sm:$0xf] }
  0xb0   : > { %v1843_v31 = vld [vmem:[#allocation3 + $0x338] sm:$0xf0] }
  0xb1   : > { %1191 = vmatpush.bf16.msra.mxu2 %v1610_v48  ;;  %1204 = vmatpush.bf16.msra.mxu3 %v1866_v49  ;;  %v1937_v48 = vld [vmem:[#allocation3 + $0x3d8] sm:$0xf]  ;;  %v1846_v37 = vor.u32 %v2048_v30, %v1843_v31 }
  0xb2   : > { %1217 = vmatpush.bf16.msrb.mxu0 %v1614_v52  ;;  %1230 = vmatpush.bf16.msrb.mxu1 %v1870_v53  ;;  %v2076_v49 = vld [vmem:[#allocation3 + $0x3f4] sm:$0xf0]  ;;  %v1706_v52 = vor.u32 %v2019_v39, %v1705_v38  ;;  %v1683_v53 = vld [vmem:[#allocation3 + $0x1f8] sm:$0xf0] }
  0xb3   : > { %v1938_v59 = vor.u32 %v2076_v49, %v1937_v48  ;;  %v1686_v62 = vor.u32 %v2008_v50, %v1683_v53  ;;  %v1809_v38 = vld [vmem:[#allocation3 + $0x2d8] sm:$0xf]  ;;  %v1814_v49 = vor.u32 %v2040_v42, %v1811_v43  ;;  %v1523_v53 = vld [vmem:[#allocation3 + $0xb8] sm:$0xf0] }
  0xb4   : > { %v2044_v39 = vld [vmem:[#allocation3 + $0x2f4] sm:$0xf0] }
  0xb5   : > { %1192 = vmatpush.bf16.msra.mxu2 %v1578_v60  ;;  %1205 = vmatpush.bf16.msra.mxu3 %v1834_v61  ;;  %v1649_v60 = vld [vmem:[#allocation3 + $0x198] sm:$0xf]  ;;  %v1810_v45 = vor.u32 %v2044_v39, %v1809_v38 }
  0xb6   : > { %1218 = vmatpush.bf16.msrb.mxu0 %v1582_v0  ;;  %1231 = vmatpush.bf16.msrb.mxu1 %v1838_v1  ;;  %v2004_v61 = vld [vmem:[#allocation3 + $0x1b4] sm:$0xf0] }
  0xb7   : > { %1145 = vmatmul.bf16.vlgmr.msrb.gmra.mxu2 %v2250_v22  ;;  %1171 = vmatmul.bf16.vlgmr.msra.gmra.mxu0 %v2250_v22  ;;  %v1905_v0 = vld [vmem:[#allocation3 + $0x398] sm:$0xf]  ;;  %v1650_v6 = vor.u32 %v2004_v61, %v1649_v60  ;;  %v1782_v61 = vor.u32 %v2032_v54, %v1779_v55 }
  0xb8   : > { %1158 = vmatmul.bf16.vlgmr.msrb.gmra.mxu3 %v2252_v23  ;;  %1184 = vmatmul.bf16.vlgmr.msra.gmra.mxu1 %v2252_v23  ;;  %v2068_v1 = vld [vmem:[#allocation3 + $0x3b4] sm:$0xf0] }
  0xb9   : > { %1193 = vmatpush.bf16.msra.mxu2 %v1546_v8  ;;  %1206 = vmatpush.bf16.msra.mxu3 %v1802_v9  ;;  %v1906_v7 = vor.u32 %v2068_v1, %v1905_v0  ;;  %v1617_v8 = vld [vmem:[#allocation3 + $0x158] sm:$0xf]  ;;  %v1960_v0 = vld [vmem:[#allocation3 + $0x5c] sm:$0xf] }
  0xba   : > { %1219 = vmatpush.bf16.msrb.mxu0 %v1550_v12  ;;  %1232 = vmatpush.bf16.msrb.mxu1 %v1806_v13  ;;  %v1996_v9 = vld [vmem:[#allocation3 + $0x174] sm:$0xf0]  ;;  %v1491_v1 = vld [vmem:[#allocation3 + $0x78] sm:$0xf0] }
  0xbb   : > { %v1873_v12 = vld [vmem:[#allocation3 + $0x358] sm:$0xf]  ;;  %v1618_v18 = vor.u32 %v1996_v9, %v1617_v8  ;;  %v1494_v8 = vor.u32 %v1960_v0, %v1491_v1  ;;  %v1750_v9 = vor.u32 %v2024_v2, %v1747_v3 }
  0xbc   : > { %v2060_v13 = vld [vmem:[#allocation3 + $0x374] sm:$0xf0] }
  0xbd   : > { %1194 = vmatpush.bf16.msra.mxu2 %v1514_v20  ;;  %1207 = vmatpush.bf16.msra.mxu3 %v1770_v21  ;;  %v1874_v19 = vor.u32 %v2060_v13, %v1873_v12  ;;  %v1585_v20 = vld [vmem:[#allocation3 + $0x118] sm:$0xf]  ;;  %v1952_v12 = vld [vmem:[#allocation3 + $0x1c] sm:$0xf] }
  0xbe   : > { %1220 = vmatpush.bf16.msrb.mxu0 %v1518_v26  ;;  %1233 = vmatpush.bf16.msrb.mxu1 %v1774_v27  ;;  %v1988_v21 = vld [vmem:[#allocation3 + $0x134] sm:$0xf0]  ;;  %v1459_v13 = vld [vmem:[#allocation3 + $0x38] sm:$0xf0] }
  0xbf   : > { %v1841_v26 = vld [vmem:[#allocation3 + $0x318] sm:$0xf]  ;;  %v1586_v32 = vor.u32 %v1988_v21, %v1585_v20 }
  0xc0   : > { %v2052_v27 = vld [vmem:[#allocation3 + $0x334] sm:$0xf0] }
  0xc1   : > { %1195 = vmatpush.bf16.msra.mxu2 %v1482_v35  ;;  %1208 = vmatpush.bf16.msra.mxu3 %v1738_v36  ;;  %v1842_v33 = vor.u32 %v2052_v27, %v1841_v26  ;;  %v1980_v35 = vld [vmem:[#allocation3 + $0xf4] sm:$0xf0]  ;;  %v1590_v36 = vor.u32 %v1984_v28, %v1587_v29 }
  0xc2   : > { %1221 = vmatpush.bf16.msrb.mxu0 %v1486_v40  ;;  %1234 = vmatpush.bf16.msrb.mxu1 %v1742_v41  ;;  %v1976_v40 = vld [vmem:[#allocation3 + $0xdc] sm:$0xf]  ;;  %v1554_v44 = vor.u32 %v1980_v35, %v1553_v34  ;;  %v1777_v50 = vld [vmem:[#allocation3 + $0x298] sm:$0xf] }
  0xc3   : > { %v1555_v41 = vld [vmem:[#allocation3 + $0xf8] sm:$0xf0] }
  0xc4   : > { %v1558_v48 = vor.u32 %v1976_v40, %v1555_v41 }
  0xc5   : > { %1196 = vmatpush.bf16.msra.mxu2 %v1450_v51  ;;  %1209 = vmatpush.bf16.msra.mxu3 %v1706_v52  ;;  %v2036_v51 = vld [vmem:[#allocation3 + $0x2b4] sm:$0xf0]  ;;  %v1968_v52 = vld [vmem:[#allocation3 + $0x9c] sm:$0xf] }
  0xc6   : > { %1222 = vmatpush.bf16.msrb.mxu0 %v1454_v56  ;;  %1235 = vmatpush.bf16.msrb.mxu1 %v1710_v57  ;;  %v1522_v56 = vor.u32 %v1972_v47, %v1521_v46  ;;  %v1778_v57 = vor.u32 %v2036_v51, %v1777_v50  ;;  %v1526_v60 = vor.u32 %v1968_v52, %v1523_v53 }
  0xc8   : > { %1197 = vmatmul.bf16.vlgmr.msra.gmra.mxu2 %v2250_v22  ;;  %1210 = vmatmul.bf16.vlgmr.msra.gmra.mxu3 %v2252_v23 }
  0xc9   : > { %1241 = vmatpush.bf16.msrb.mxu2 %v1682_v58  ;;  %1254 = vmatpush.bf16.msrb.mxu3 %v1938_v59  ;;  %v1489_v58 = vld [vmem:[#allocation3 + $0x58] sm:$0xf] }
  0xca   : > { %1267 = vmatpush.bf16.msra.mxu0 %v1686_v62  ;;  %1280 = vmatpush.bf16.msra.mxu1 %v1942_v63  ;;  %v1964_v59 = vld [vmem:[#allocation3 + $0x74] sm:$0xf0] }
  0xcb   : > { %1223 = vmatmul.bf16.vlgmr.msrb.gmra.mxu0 %v2250_v22  ;;  %1236 = vmatmul.bf16.vlgmr.msrb.gmra.mxu1 %v2252_v23  ;;  %v1745_v62 = vld [vmem:[#allocation3 + $0x258] sm:$0xf]  ;;  %v1490_v4 = vor.u32 %v1964_v59, %v1489_v58 }
  0xcc   : > { %v2028_v63 = vld [vmem:[#allocation3 + $0x274] sm:$0xf0] }
  0xcd   : > { %1242 = vmatpush.bf16.msrb.mxu2 %v1650_v6  ;;  %1255 = vmatpush.bf16.msrb.mxu3 %v1906_v7  ;;  %v1746_v5 = vor.u32 %v2028_v63, %v1745_v62  ;;  %v1457_v6 = vld [vmem:[#allocation3 + $0x18] sm:$0xf] }
  0xce   : > { %1268 = vmatpush.bf16.msra.mxu0 %v1654_v10  ;;  %1281 = vmatpush.bf16.msra.mxu1 %v1910_v11  ;;  %v1956_v7 = vld [vmem:[#allocation3 + $0x34] sm:$0xf0] }
  0xcf   : > { %v1713_v10 = vld [vmem:[#allocation3 + $0x218] sm:$0xf]  ;;  %v1458_v16 = vor.u32 %v1956_v7, %v1457_v6 }
  0xd0   : > { %v2020_v11 = vld [vmem:[#allocation3 + $0x234] sm:$0xf0] }
  0xd1   : > { %1243 = vmatpush.bf16.msrb.mxu2 %v1618_v18  ;;  %1256 = vmatpush.bf16.msrb.mxu3 %v1874_v19  ;;  %v1714_v17 = vor.u32 %v2020_v11, %v1713_v10  ;;  %v1462_v18 = vor.u32 %v1952_v12, %v1459_v13  ;;  %v1718_v19 = vor.u32 %v2016_v14, %v1715_v15 }
  0xd2   : > { %1269 = vmatpush.bf16.msra.mxu0 %v1622_v24  ;;  %1282 = vmatpush.bf16.msra.mxu1 %v1878_v25 }
  0xd5   : > { %1244 = vmatpush.bf16.msrb.mxu2 %v1586_v32  ;;  %1257 = vmatpush.bf16.msrb.mxu3 %v1842_v33 }
  0xd6   : > { %1270 = vmatpush.bf16.msra.mxu0 %v1590_v36  ;;  %1283 = vmatpush.bf16.msra.mxu1 %v1846_v37 }
  0xd9   : > { %1245 = vmatpush.bf16.msrb.mxu2 %v1554_v44  ;;  %1258 = vmatpush.bf16.msrb.mxu3 %v1810_v45 }
  0xda   : > { %1271 = vmatpush.bf16.msra.mxu0 %v1558_v48  ;;  %1284 = vmatpush.bf16.msra.mxu1 %v1814_v49 }
  0xdd   : > { %1246 = vmatpush.bf16.msrb.mxu2 %v1522_v56  ;;  %1259 = vmatpush.bf16.msrb.mxu3 %v1778_v57 }
  0xde   : > { %1272 = vmatpush.bf16.msra.mxu0 %v1526_v60  ;;  %1285 = vmatpush.bf16.msra.mxu1 %v1782_v61 }
  0xe1   : > { %1247 = vmatpush.bf16.msrb.mxu2 %v1490_v4  ;;  %1260 = vmatpush.bf16.msrb.mxu3 %v1746_v5 }
  0xe2   : > { %1273 = vmatpush.bf16.msra.mxu0 %v1494_v8  ;;  %1286 = vmatpush.bf16.msra.mxu1 %v1750_v9 }
  0xe5   : > { %1248 = vmatpush.bf16.msrb.mxu2 %v1458_v16  ;;  %1261 = vmatpush.bf16.msrb.mxu3 %v1714_v17 }
  0xe6   : > { %1274 = vmatpush.bf16.msra.mxu0 %v1462_v18  ;;  %1287 = vmatpush.bf16.msra.mxu1 %v1718_v19 }
  0xe8   : > { %1249 = vmatmul.bf16.vlgmr.msrb.gmra.mxu2 %v2250_v22  ;;  %1262 = vmatmul.bf16.vlgmr.msrb.gmra.mxu3 %v2252_v23 }
  0xe9   : > { %1275 = vmatmul.bf16.vlgmr.msra.gmra.mxu0 %v2250_v22  ;;  %1288 = vmatmul.bf16.vlgmr.msra.gmra.mxu1 %v2252_v23 }
 0x124   : > { %v1120_v20 = vpop.f32.mrf.mxu0 }
 0x125   : > { %v1133_v21 = vpop.f32.mrf.mxu1 }
 0x126   : > { %v1134_v24 = vadd.f32 %v1133_v21, %v1120_v20 }
 0x128   : > { %1294 = vst [vmem:[%s2233_s12 + $0x48] sm:$0xff] %v1134_v24 }
 0x12a   : > { %v1094_v25 = vpop.f32.mrf.mxu2 }
 0x12b   : > { %v1107_v26 = vpop.f32.mrf.mxu3 }
 0x12c   : > { %v1108_v27 = vadd.f32 %v1107_v26, %v1094_v25  ;;  %v1122_v28 = vpop.f32.mrf.mxu0 }
 0x12d   : > { %v1135_v29 = vpop.f32.mrf.mxu1 }
 0x12e   : > { %1293 = vst [vmem:[%s2233_s12 + $0x40] sm:$0xff] %v1108_v27 }
 0x132   : > { %v1096_v30 = vpop.f32.mrf.mxu2 }
 0x133   : > { %v1109_v31 = vpop.f32.mrf.mxu3 }
 0x134   : > { %v1172_v32 = vpop.f32.mrf.mxu0 }
 0x135   : > { %v1185_v33 = vpop.f32.mrf.mxu1 }
 0x136   : > { %v1186_v22 = vadd.f32 %v1185_v33, %v1172_v32 }
 0x138   : > { %1296 = vst [vmem:[%s2233_s12 + $0x58] sm:$0xff] %v1186_v22 }
 0x13a   : > { %v1146_v23 = vpop.f32.mrf.mxu2 }
 0x13b   : > { %v1159_v34 = vpop.f32.mrf.mxu3 }
 0x13c   : > { %v1160_v35 = vadd.f32 %v1159_v34, %v1146_v23  ;;  %v1174_v36 = vpop.f32.mrf.mxu0 }
 0x13d   : > { %v1187_v37 = vpop.f32.mrf.mxu1 }
 0x13e   : > { %1295 = vst [vmem:[%s2233_s12 + $0x50] sm:$0xff] %v1160_v35 }
 0x142   : > { %v1148_v38 = vpop.f32.mrf.mxu2 }
 0x143   : > { %v1161_v39 = vpop.f32.mrf.mxu3 }
 0x148   : > { %v1224_v40 = vpop.f32.mrf.mxu0  ;;  %v1237_v41 = vpop.f32.mrf.mxu1 }
 0x149   : > { %v1238_v42 = vadd.f32 %v1237_v41, %v1224_v40 }
 0x14b   : > { %1298 = vst [vmem:[%s2233_s12 + $0x68] sm:$0xff] %v1238_v42  ;;  %v1198_v43 = vpop.f32.mrf.mxu2  ;;  %v1211_v44 = vpop.f32.mrf.mxu3 }
 0x14c   : > { %v1212_v45 = vadd.f32 %v1211_v44, %v1198_v43 }
 0x14e   : > { %1297 = vst [vmem:[%s2233_s12 + $0x60] sm:$0xff] %v1212_v45 }
 0x150   : > { %v1226_v46 = vpop.f32.mrf.mxu0  ;;  %v1239_v47 = vpop.f32.mrf.mxu1 }
 0x153   : > { %v1200_v48 = vpop.f32.mrf.mxu2  ;;  %v1213_v49 = vpop.f32.mrf.mxu3 }
 0x166   : > { %v1276_v50 = vpop.f32.mrf.mxu0  ;;  %v1289_v51 = vpop.f32.mrf.mxu1 }
 0x167   : > { %v1290_v52 = vadd.f32 %v1289_v51, %v1276_v50 }
 0x169   : > { %1300 = vst [vmem:[%s2233_s12 + $0x78] sm:$0xff] %v1290_v52 }
 0x16b   : > { %v1250_v53 = vpop.f32.mrf.mxu2  ;;  %v1263_v54 = vpop.f32.mrf.mxu3 }
 0x16c   : > { %v1264_v55 = vadd.f32 %v1263_v54, %v1250_v53 }
 0x16e   : > { %1299 = vst [vmem:[%s2233_s12 + $0x70] sm:$0xff] %v1264_v55  ;;  %v1278_v56 = vpop.f32.mrf.mxu0  ;;  %v1291_v57 = vpop.f32.mrf.mxu1 }
 0x173   : > { %v1252_v58 = vpop.f32.mrf.mxu2  ;;  %v1265_v59 = vpop.f32.mrf.mxu3 }
 0x174   : > { %2160 = dma.done.wait [#allocation2], 1024 }
 0x175   : > { %2161 = vsyncadd [#allocation2], 4294966272 }
 0x176 PF: > { %s15_s17 = sadd.s32 1, %s2172_s17   ;;  %s2292_s15 = smov %s2168_s16 }
 0x177   : > { %p12_p8 = scmp.ge.s32.totalorder %s15_s17, 4   ;;  %s2293_s16 = smov %s2295_s19 }
 0x179   :  { %14 = sbr.rel (!%p12_p8) target bundleno = 2 (0x2), region = 92 }
 0x17e   :  { %1335 = vsyncpa [#allocation4], 1 }
 0x17f   :  { %1337 = vsyncpa [#allocation4 + $0x1], 1 }
 0x180   :  { %1338 = vsyncmov [#allocation2] }
 0x183   :  { %s1339_s18 = vpop.sfrf %1338 }
 0x184   :  { %p1945_p9 = scmp.ne.s32.totalorder %s1339_s18, 0 }
 0x186   :  { %1343 = shalt.err (%p1945_p9)  }

</bundles_post_ra>
